<compile_context>
chip_gen: v7x
topology: tpu7x:2x2x1
jax: 0.10.0
libtpu: 0.0.40
codegen_flags: <defaults>
</compile_context>

<pallas_src>
import functools

import jax
import jax.numpy as jnp
from jax.experimental import pallas as pl
from jax.experimental.pallas import tpu as pltpu


def _round_up(v: int, m: int) -> int:
    return ((v + m - 1) // m) * m


def _choose_tile(total: int, cap: int, unit: int, min_blocks: int = 1) -> int:
    """Largest multiple of `unit` that divides `total`, is <= cap and (if
    possible) leaves at least `min_blocks` blocks along this axis."""
    n_units = total // unit
    divs = [d for d in range(1, n_units + 1)
            if n_units % d == 0 and unit * d <= cap]
    good = [d for d in divs if (n_units // d) >= min_blocks]
    return unit * (max(good) if good else max(divs))


# --------------------------------------------------------------------------
# Kernels
# --------------------------------------------------------------------------
def _linblock_kernel_f32out(x_ref, w_ref, b_ref, o_ref):
    """f32 output: accumulate directly into the K-resident output tile."""
    k = pl.program_id(2)

    @pl.when(k == 0)
    def _():
        # Fold the bias into the accumulator init (saves an epilogue add).
        o_ref[...] = jnp.broadcast_to(b_ref[...], o_ref.shape)

    o_ref[...] += jnp.dot(x_ref[...], w_ref[...],
                          preferred_element_type=jnp.float32)

    @pl.when(k == pl.num_programs(2) - 1)
    def _():
        y = o_ref[...]
        # LeakyReLU, negative_slope = 0.01 (nn.LeakyReLU default).
        o_ref[...] = jnp.where(y >= 0.0, y, 0.01 * y)


def _linblock_kernel_acc(x_ref, w_ref, b_ref, o_ref, acc_ref):
    """Non-f32 output: f32 VMEM scratch accumulator, cast in the epilogue."""
    k = pl.program_id(2)

    @pl.when(k == 0)
    def _():
        acc_ref[...] = jnp.broadcast_to(b_ref[...], acc_ref.shape)

    acc_ref[...] += jnp.dot(x_ref[...], w_ref[...],
                            preferred_element_type=jnp.float32)

    @pl.when(k == pl.num_programs(2) - 1)
    def _():
        y = acc_ref[...]
        o_ref[...] = jnp.where(y >= 0.0, y, 0.01 * y).astype(o_ref.dtype)


def _linblock_small_kernel(x_ref, w_ref, b_ref, o_ref, *, compute_dtype):
    """Single-block fast path: full arrays in VMEM, no grid, no padding."""
    x = x_ref[...].astype(compute_dtype)
    w = w_ref[...].astype(compute_dtype)
    y = jnp.dot(x, w, preferred_element_type=jnp.float32) + b_ref[...]
    o_ref[...] = jnp.where(y >= 0.0, y, 0.01 * y).astype(o_ref.dtype)


# --------------------------------------------------------------------------
# Wrapper
# --------------------------------------------------------------------------
def linblock_forward(x, weight_io, bias, *, compute_dtype=jnp.bfloat16,
                     tm_cap=512, tn_cap=None, tk_cap=1024):
    """y = leaky_relu(x @ weight_io + bias)

    x:         (B, in_features)
    weight_io: (in_features, out_features)  -- transpose of PyTorch layout,
               done ONCE at init/load (see weight_from_torch_layout).
    bias:      (out_features,)
    """
    B, in_f = x.shape
    k_w, out_f = weight_io.shape
    assert k_w == in_f, "weight must be in (in_features, out_features) layout"

    compute_dtype = jnp.dtype(compute_dtype)
    out_dtype = x.dtype
    bias_f32 = bias.astype(jnp.float32)

    # Tiny-layer fast path: one un-gridded call, full-array blocks, no padding
    # (launch-overhead dominated regime; pad/slice would cost more than the dot).
    if B * in_f + in_f * out_f + B * out_f <= 32 * 1024:
        return pl.pallas_call(
            functools.partial(_linblock_small_kernel,
                              compute_dtype=compute_dtype),
            out_shape=jax.ShapeDtypeStruct((B, out_f), out_dtype),
        )(x, weight_io, bias_f32.reshape(1, out_f))

    is_bf16 = compute_dtype == jnp.dtype(jnp.bfloat16)
    if tn_cap is None:
        tn_cap = 1024 if is_bf16 else 512

    # Alignment units: lanes = 128, sublanes = 8 (16 for bf16 packing).
    unit_m = 16 if is_bf16 else 8
    Bp = _round_up(B, unit_m)
    Np = _round_up(out_f, 128)
    Kp = _round_up(in_f, 128)

    tm = _choose_tile(Bp, tm_cap, unit_m)
    tn = _choose_tile(Np, tn_cap, 128)
    if (Bp // tm) * (Np // tn) < 2:
        # Keep v7x's second TensorCore busy: split N (preferred) or M.
        if Np // 128 >= 2:
            tn = _choose_tile(Np, tn_cap, 128, min_blocks=2)
        elif Bp // unit_m >= 2:
            tm = _choose_tile(Bp, tm_cap, unit_m, min_blocks=2)
    tk = _choose_tile(Kp, tk_cap, 128)

    # Pad only to alignment units (tiles divide the padded dims exactly, so no
    # extra padding up to tile multiples -> no dead flops / HBM traffic).
    xp = x if (Bp == B and Kp == in_f) else jnp.pad(
        x, ((0, Bp - B), (0, Kp - in_f)))
    wp = weight_io if (Kp == in_f and Np == out_f) else jnp.pad(
        weight_io, ((0, Kp - in_f), (0, Np - out_f)))
    bp = (bias_f32 if Np == out_f
          else jnp.pad(bias_f32, (0, Np - out_f))).reshape(1, Np)

    xp = xp.astype(compute_dtype)
    wp = wp.astype(compute_dtype)

    grid = (Bp // tm, Np // tn, Kp // tk)

    if out_dtype == jnp.float32:
        kernel = _linblock_kernel_f32out
        scratch = []
    else:
        kernel = _linblock_kernel_acc
        scratch = [pltpu.VMEM((tm, tn), jnp.float32)]

    in_itemsize = compute_dtype.itemsize
    cost = pl.CostEstimate(
        flops=2 * Bp * Np * Kp,
        transcendentals=0,
        bytes_accessed=(xp.size * in_itemsize * (Np // tn)      # x re-read per N block
                        + wp.size * in_itemsize * (Bp // tm)    # w re-read per M block
                        + bp.size * 4 * (Bp // tm)
                        + Bp * Np * jnp.dtype(out_dtype).itemsize),
    )

    out = pl.pallas_call(
        kernel,
        out_shape=jax.ShapeDtypeStruct((Bp, Np), out_dtype),
        grid_spec=pltpu.PrefetchScalarGridSpec(
            num_scalar_prefetch=0,
            grid=grid,
            in_specs=[
                pl.BlockSpec((tm, tk), lambda i, j, k: (i, k)),   # x tile
                pl.BlockSpec((tk, tn), lambda i, j, k: (k, j)),   # w tile (in, out)
                pl.BlockSpec((1, tn), lambda i, j, k: (0, j)),    # bias tile
            ],
            out_specs=pl.BlockSpec((tm, tn), lambda i, j, k: (i, j)),
            scratch_shapes=scratch,
        ),
        compiler_params=pltpu.CompilerParams(
            dimension_semantics=("parallel", "parallel", "arbitrary"),
        ),
        cost_estimate=cost,
    )(xp, wp, bp)

    if Bp != B or Np != out_f:
        out = out[:B, :out_f]
    return out


# --------------------------------------------------------------------------
# Params
# --------------------------------------------------------------------------
def init_linblock_params(key, in_features, out_features):
    """nn.Linear-style init (U(-1/sqrt(in), 1/sqrt(in))) with the weight
    returned in (in, out) layout so the kernel runs a canonical matmul
    (transpose happens once here, never per forward call)."""
    kw, kb = jax.random.split(key)
    bound = 1.0 / jnp.sqrt(jnp.float32(in_features))
    weight_io = jax.random.uniform(kw, (in_features, out_features),
                                   jnp.float32, minval=-bound, maxval=bound)
    bias = jax.random.uniform(kb, (out_features,), jnp.float32,
                              minval=-bound, maxval=bound)
    return weight_io, bias


def weight_from_torch_layout(weight_oi):
    """One-time conversion of a PyTorch nn.Linear (out, in) weight."""
    return jnp.asarray(weight_oi).T


def _reference(x, weight_io, bias):
    y = x @ weight_io + bias
    return jnp.where(y >= 0.0, y, 0.01 * y)


if __name__ == "__main__":
    key = jax.random.PRNGKey(0)
    k_x, k_p, k_x2, k_p2 = jax.random.split(key, 4)

    # Small shapes consistent with the module (hits the un-gridded fast path).
    batch, in_features, out_features = 8, 32, 64
    x = jax.random.normal(k_x, (batch, in_features), jnp.float32)
    w_io, b = init_linblock_params(k_p, in_features, out_features)
    ref = _reference(x, w_io, b)

    out_f32 = jax.block_until_ready(
        linblock_forward(x, w_io, b, compute_dtype=jnp.float32))
    assert out_f32.shape == (batch, out_features)
    assert jnp.allclose(out_f32, ref, atol=1e-5, rtol=1e-5)

    out_bf16 = jax.block_until_ready(linblock_forward(x, w_io, b))  # default bf16 MXU inputs
    assert jnp.allclose(out_bf16, ref, atol=2e-2, rtol=2e-2)

    # Larger case exercising the tiled path: K padding (1000 -> 1024) and a
    # multi-block N grid so both v7x TensorCores get work.
    batch2, in2, out2 = 64, 1000, 200
    x2 = jax.random.normal(k_x2, (batch2, in2), jnp.float32)
    w2_io, b2 = init_linblock_params(k_p2, in2, out2)
    ref2 = _reference(x2, w2_io, b2)

    out2_f32 = jax.block_until_ready(
        linblock_forward(x2, w2_io, b2, compute_dtype=jnp.float32))
    assert out2_f32.shape == (batch2, out2)
    assert jnp.allclose(out2_f32, ref2, atol=1e-4, rtol=1e-4)

    out2_bf16 = jax.block_until_ready(linblock_forward(x2, w2_io, b2))
    assert jnp.allclose(out2_bf16, ref2, atol=5e-2, rtol=5e-2)

    print("KERNEL_OK")
</pallas_src>

<mosaic_0001>
module attributes {stable_mosaic.version = 11 : i64} {
  func.func @_linblock_small_kernel(%arg0: memref<8x32xf32, #tpu.memory_space<vmem>>, %arg1: memref<32x64xf32, #tpu.memory_space<vmem>>, %arg2: memref<1x64xf32, #tpu.memory_space<vmem>>, %arg3: memref<8x64xf32, #tpu.memory_space<vmem>>) attributes {dimension_semantics = [], scalar_prefetch = 0 : i64, scratch_operands = 0 : i64, tpu.core_type = #tpu.core_type<tc>} {
    %c0 = arith.constant 0 : index
    %c0_0 = arith.constant 0 : index
    %0 = vector.load %arg0[%c0, %c0_0] : memref<8x32xf32, #tpu.memory_space<vmem>>, vector<8x32xf32>
    %c0_1 = arith.constant 0 : index
    %c0_2 = arith.constant 0 : index
    %1 = vector.load %arg1[%c0_1, %c0_2] : memref<32x64xf32, #tpu.memory_space<vmem>>, vector<32x64xf32>
    %cst = arith.constant dense<0.000000e+00> : vector<8x64xf32>
    %2 = tpu.matmul %0, %1, %cst {dimension_numbers = #tpu.dot_dimension_numbers<[1], [0], [0], [1], [0, 0, 1, 1], [], []>} : vector<8x32xf32>, vector<32x64xf32>, vector<8x64xf32> -> vector<8x64xf32>
    %c0_3 = arith.constant 0 : index
    %c0_4 = arith.constant 0 : index
    %3 = vector.load %arg2[%c0_3, %c0_4] : memref<1x64xf32, #tpu.memory_space<vmem>>, vector<1x64xf32>
    %4 = vector.broadcast %3 : vector<1x64xf32> to vector<8x64xf32>
    %5 = arith.addf %2, %4 : vector<8x64xf32>
    %cst_5 = arith.constant 0.000000e+00 : f32
    %6 = vector.broadcast %cst_5 : f32 to vector<8x64xf32>
    %7 = arith.cmpf oge, %5, %6 : vector<8x64xf32>
    %cst_6 = arith.constant 0.00999999977 : f32
    %8 = vector.broadcast %cst_6 : f32 to vector<8x64xf32>
    %9 = arith.mulf %8, %5 : vector<8x64xf32>
    %10 = arith.select %7, %5, %9 : vector<8x64xi1>, vector<8x64xf32>
    %c0_7 = arith.constant 0 : index
    %c0_8 = arith.constant 0 : index
    %11 = vector.load %arg3[%c0_7, %c0_8] : memref<8x64xf32, #tpu.memory_space<vmem>>, vector<8x64xf32>
    tpu.vector_store %arg3[%c0_7, %c0_8], %10 {strides = array<i32>} : memref<8x64xf32, #tpu.memory_space<vmem>>, vector<8x64xf32>,
    return
  }
}

</mosaic_0001>

<bundles_post_ra>
// kernel: tpu_custom_call.1
= control target key start
LH: loop header
LB: loop body
LE: loop exit
PB: predicated region body
PF: predicated region fallthrough
CT: control target
= control target key end

     0   :  { %8 = vsyncpa [#allocation3], 0  ;;  %s326_s0 = inlined_call_operand.hbm [shape: f32[8,32], index: 0, kind: input, shape index: {}]   ;;  %s327_s1 = inlined_call_operand.hbm [shape: f32[32,64], index: 1, kind: input, shape index: {}]   ;;  %s328_s2 = inlined_call_operand.vmem [shape: f32[1,64], index: 2, kind: input, shape index: {}]   ;;  %s329_s3 = inlined_call_operand.hbm [shape: f32[8,64], index: 3, kind: output, shape index: {}]  }
   0x1   :  { %9 = vsyncpa [#allocation6], 0 }
   0x2   :  { %10 = vsyncpa [#allocation4], 0  ;;  %s252_s12 = smov [#allocation2]   ;;  %s253_s14 = smov [#allocation5]  }
   0x3   :  { %s17_s13 = sshll.u32 %s252_s12, 4  ;;  %s26_s15 = sshll.u32 %s253_s14, 4  ;;  %s18_s13 = int_to_ptr.vmem [resolvable:$true] %s17_s13  ;;  %s280_s15 = int_to_ptr.vmem [resolvable:$true] %s26_s15 }
   0x4   :  { %s180_s18 = scalar_lea.hbm %s326_s0, 128 }
   0x5   :  { %p181_p0 = scmp.ne.s32.totalorder %s326_s0, %s180_s18  ;;  %p184_p1 = scmp.lt.u32.totalorder %s180_s18, %s326_s0 }
   0x7   :  { %p186_p2 = pnand %p184_p1, %p181_p0 }
   0x9   :  { %189 = shalt.err (!%p186_p2)
}
   0xa   :  { %s190_s23 = scalar_lea.vmem %s18_s13, 128  ;;  %p195_p4 = scmp.lt.s32.totalorder %s18_s13, %s18_s13 }
   0xb   :  { %p191_p3 = scmp.ne.s32.totalorder %s18_s13, %s190_s23  ;;  %p196_p5 = scmp.lt.s32.totalorder %s190_s23, %s190_s23 }
   0xd   :  { %p197_p6 = por %p196_p5, %p195_p4 }
   0xf   :  { %p198_p7 = pnand %p197_p6, %p191_p3 }
  0x11   :  { %201 = shalt.err (!%p198_p7)
}
  0x12   :  { %20 = dma.hbm_to_vmem [thread:$0]  %s326_s0, 128, %s18_s13, [#allocation3]  }
  0x13   :  { %s202_s28 = scalar_lea.hbm %s327_s1, 512 }
  0x14   :  { %p203_p8 = scmp.ne.s32.totalorder %s327_s1, %s202_s28  ;;  %p206_p9 = scmp.lt.u32.totalorder %s202_s28, %s327_s1 }
  0x16   :  { %p208_p10 = pnand %p206_p9, %p203_p8 }
  0x18   :  { %211 = shalt.err (!%p208_p10)
}
  0x19   :  { %s212_s6 = scalar_lea.vmem %s280_s15, 512  ;;  %p217_p12 = scmp.lt.s32.totalorder %s280_s15, %s280_s15 }
  0x1a   :  { %p213_p11 = scmp.ne.s32.totalorder %s280_s15, %s212_s6  ;;  %p218_p13 = scmp.lt.s32.totalorder %s212_s6, %s212_s6 }
  0x1c   :  { %p219_p0 = por %p218_p13, %p217_p12 }
  0x1e   :  { %p220_p1 = pnand %p219_p0, %p213_p11 }
  0x20   :  { %223 = shalt.err (!%p220_p1)
}
  0x21   :  { %s254_s0 = smov 128   ;;  %s255_s7 = smov 8  }
  0x22   :  { %32 = dma.hbm_to_vmem [thread:$0]  %s327_s1, 512, %s280_s15, [#allocation6], %s254_s0, %s254_s0, %s255_s7  }
  0x23   :  { %246 = dma.done.wait [#allocation3], 128  }
  0x24   :  { %247 = vsyncadd [#allocation3], 4294967168 }
  0x25   :  { %248 = dma.done.wait [#allocation6], 512  }
  0x26   :  { %249 = vsyncadd [#allocation6], 4294966784  ;;  %v256_v0 = vmov 0.0|0.0   ;;  %vm257_vm0 = vmmov 0   ;;  %v258_v1 = vmov 0.0   ;;  %v42_v2 = vld [vmem:[#allocation5] sm:$0xff] }
  0x27   :  { %166 = vmatprep.subr.bf16.mxu0 %v256_v0  ;;  %163 = vmatprep.mubr.msk.f32.mxu0 %vm257_vm0, %v258_v1  ;;  %v43_v3 = vld [vmem:[#allocation5 + $0x8] sm:$0xff]  ;;  %v44_v4 = vld [vmem:[#allocation5 + $0x10] sm:$0xff]  ;;  %v45_v6 = vld [vmem:[#allocation5 + $0x18] sm:$0xff]  ;;  %vm53_vm1 = vcmask 261120   ;;  %s259_s11 = smov [#allocation7]   ;;  %vm130_vm3 = vcmask 523264  }
  0x28   :  { %v167_v5 = vpack.c.bf16 %v43_v3, %v42_v2  ;;  %v170_v7 = vpack.c.bf16 %v45_v6, %v44_v4  ;;  %v41_v8 = vld [vmem:[#allocation2] sm:$0xff]  ;;  %s138_s12 = sshll.u32 %s259_s11, 4  ;;  %s139_s12 = int_to_ptr.vmem [resolvable:$true] %s138_s12 }
  0x29   :  { %v148_v9 = vld [vmem:[%s328_s2] ss:$0 sm:$0xff]  ;;  %s224_s13 = scalar_lea.vmem %s139_s12, 128  ;;  %p229_p3 = scmp.lt.s32.totalorder %s139_s12, %s139_s12 }
  0x2a   :  { %168 = vmatpush3.bf16.msra.mxu0 %v167_v5  ;;  %p225_p2 = scmp.ne.s32.totalorder %s139_s12, %s224_s13  ;;  %p230_p4 = scmp.lt.s32.totalorder %s224_s13, %s224_s13 }
  0x2b   :  { %169 = vmatprep.subr.bf16.mxu0 %v256_v0 }
  0x2c   :  { %p231_p5 = por %p230_p4, %p229_p3 }
  0x2e   :  { %171 = vmatpush3.bf16.msra.mxu0 %v170_v7  ;;  %p232_p6 = pnand %p231_p5, %p225_p2 }
  0x31   :  { %164 = vmatmul.mubr.msk.f32.vlgmr.msra.gmra.mrb[0].mxu0 %vm53_vm1, %v41_v8 }
 0x104   :  { %v123_v10 = vpop.f32.mrb[0].mxu0 }
 0x105   :  { %v124_v11 = vadd.f32 %v148_v9, %v123_v10  ;;  %v165_v12 = vpop.f32.mrb[1].mxu0 }
 0x107   :  { %vm127_vm2 = vcmp.ge.f32.partialorder %v124_v11, 0.0  ;;  %v128_v13 = vmul.f32 0.01, %v124_v11 }
 0x109   :  { %v129_v14 = vsel %vm127_vm2, %v124_v11, %v128_v13 }
 0x10a   :  { %131 = vst.msk [vmem:[#allocation7] sm:$0xff] %vm130_vm3, %v129_v14 }
 0x10b   :  { %235 = shalt.err (!%p232_p6)
}
 0x10c   :  { %s236_s15 = scalar_lea.hbm %s329_s3, 128 }
 0x10d   :  { %p237_p7 = scmp.ne.s32.totalorder %s329_s3, %s236_s15  ;;  %p240_p8 = scmp.lt.u32.totalorder %s236_s15, %s329_s3 }
 0x10f   :  { %p242_p9 = pnand %p240_p8, %p237_p7 }
 0x111   :  { %245 = shalt.err (!%p242_p9)
}
 0x112   :  { %141 = dma.vmem_to_hbm [thread:$0]  %s139_s12, 128, %s329_s3, [#allocation4]  }
 0x113   :  { %250 = dma.done.wait [#allocation4], 128  }
 0x114   :  { %251 = vsyncadd [#allocation4], 4294967168 }
 0x115   :  { %145 = vsyncpa [#allocation3], 1 }
 0x116   :  { %146 = vsyncpa [#allocation6], 1 }
 0x117   :  { %147 = vsyncpa [#allocation4], 1 }

</bundles_post_ra>
